<compile_context>
chip_gen: v5e
topology: v5e:2x2
jax: 0.10.0
libtpu: 0.0.40
codegen_flags: <defaults>
</compile_context>

<pallas_src>
import functools

import jax
import jax.numpy as jnp
from jax.experimental import pallas as pl
from jax.experimental.pallas import tpu as pltpu

LANE = 128     # lane width of the flattened layout
SUBLANE = 8    # f32 sublane count


def _cdiv(a, b):
    return -(-a // b)


def _round_up(a, b):
    return _cdiv(a, b) * b


def _device_defaults():
    """Return (tile_rows, num_shards) tuned per TPU generation."""
    try:
        kind = jax.devices()[0].device_kind.lower()
    except Exception:
        kind = ""
    if "v7" in kind or "7x" in kind:
        # 64 MiB physical VMEM, 3.2 TB/s HBM: big tiles amortize the
        # ~0.35 us per-step overhead; 2 partial-sum shards for the 2 TCs.
        return 8192, 2
    # v6e / v5e / unknown: ~4 MiB of double-buffered inputs at 2048 rows,
    # safely under the 16 MiB v5e scoped-VMEM default.
    return 2048, 1


def _focal_kernel(yt_ref, yp_ref, o_ref, acc_ref, *,
                  gamma, alpha0, alpha1,
                  full_rows, rem_lanes, mask_any,
                  tiles_per_shard, tile_rows):
    p = pl.program_id(0)   # shard axis ("parallel")
    t = pl.program_id(1)   # reduction axis ("arbitrary")

    @pl.when(t == 0)
    def _():
        acc_ref[...] = jnp.zeros_like(acc_ref)

    # Native-dtype DMA; cast to f32 only inside the kernel.
    yp = yp_ref[...].astype(jnp.float32)
    yt = yt_ref[...].astype(jnp.float32)

    log_p = jnp.log(yp + 1e-6)
    log_1mp = jnp.log(1.0 - yp + 1e-6)
    if gamma == 0:
        # x**0 == 1 -> skip the pow statically (EUP stays at 2 logs/elem).
        pos = -yt * log_p
        neg = -(1.0 - yt) * log_1mp
    elif gamma == 1:
        pos = -yt * (1.0 - yp) * log_p
        neg = -(1.0 - yt) * yp * log_1mp
    else:
        # Integer gamma (coerced in the wrapper) lowers to lax.integer_pow
        # (pure VPU multiplies); float gamma falls back to exp(g*log(x)).
        pos = -yt * (1.0 - yp) ** gamma * log_p
        neg = -(1.0 - yt) * (yp ** gamma) * log_1mp
    loss = alpha0 * pos + alpha1 * neg

    def fold(x):
        # (tile_rows, 128) -> (8, 128) via a balanced tree of VPU adds.
        parts = [x[j * SUBLANE:(j + 1) * SUBLANE, :]
                 for j in range(tile_rows // SUBLANE)]
        while len(parts) > 1:
            nxt = [parts[i] + parts[i + 1] for i in range(0, len(parts) - 1, 2)]
            if len(parts) % 2:
                nxt.append(parts[-1])
            parts = nxt
        return parts[0]

    if mask_any:
        # Logical first row of this tile (row-based -> no flat-index
        # int32-overflow concern even for multi-billion-element inputs).
        row0 = (p * tiles_per_shard + t) * tile_rows
        tile_needs_mask = row0 + tile_rows > full_rows

        @pl.when(jnp.logical_not(tile_needs_mask))
        def _():
            # Steady-state tiles: pure loss math, one acc vld + vst.
            acc_ref[...] += fold(loss)

        @pl.when(tile_needs_mask)
        def _():
            # Tail tile(s) only: mask padded / clamped-boundary / overshoot
            # elements with a select BEFORE accumulating (garbage/NaN safe).
            r = jax.lax.broadcasted_iota(jnp.int32, loss.shape, 0)
            row = row0 + r
            valid = row < full_rows
            if rem_lanes:
                lane = jax.lax.broadcasted_iota(jnp.int32, loss.shape, 1)
                valid = jnp.logical_or(
                    valid, jnp.logical_and(row == full_rows, lane < rem_lanes))
            acc_ref[...] += fold(jnp.where(valid, loss, 0.0))
    else:
        acc_ref[...] += fold(loss)

    @pl.when(t == tiles_per_shard - 1)
    def _():
        o_ref[...] = acc_ref[...]


def focal_loss(y_true, y_pred, *, gamma=0, alpha=(0.25, 0.75),
               size_average=True, tile_rows=None, num_shards=None):
    """FocalLoss.forward(y_true, y_pred). gamma/alpha are static Python numbers."""
    assert y_true.shape == y_pred.shape
    total = int(y_true.size)
    assert total > 0
    alpha0 = float(alpha[0])
    alpha1 = float(alpha[1])

    # Integral gamma -> python int so x**gamma lowers to lax.integer_pow.
    g = float(gamma)
    gamma = int(g) if g.is_integer() else g

    d_tile, d_shards = _device_defaults()
    tile_rows = int(tile_rows) if tile_rows is not None else d_tile
    tile_rows = max(SUBLANE, _round_up(tile_rows, SUBLANE))
    if num_shards is None:
        num_shards = d_shards

    full_rows = total // LANE      # complete 128-lane rows
    rem_lanes = total % LANE       # valid lanes in the final partial row
    rows = _cdiv(total, LANE)      # rows actually holding data

    if rows >= tile_rows:
        tr = tile_rows             # multiple of 8; boundary block may be partial
        pad_rows = rows
    else:
        # Whole input fits in one tile: make that single tile 8-row aligned.
        tr = _round_up(rows, SUBLANE)
        pad_rows = tr

    padded_total = pad_rows * LANE
    yt = y_true.reshape(-1)
    yp = y_pred.reshape(-1)
    if padded_total != total:
        # Tiny pad: only when total isn't a multiple of 128 (or the input is
        # smaller than one aligned tile). Large 128-multiple inputs stream
        # with NO extra HBM copy — partial boundary blocks + in-kernel
        # masking handle ragged row counts.
        yt = jnp.pad(yt, (0, padded_total - total))
        yp = jnp.pad(yp, (0, padded_total - total))
    yt2 = yt.reshape(pad_rows, LANE)
    yp2 = yp.reshape(pad_rows, LANE)

    num_tiles = _cdiv(pad_rows, tr)
    num_shards = max(1, min(int(num_shards), num_tiles))
    tiles_per_shard = _cdiv(num_tiles, num_shards)
    grid_rows = num_shards * tiles_per_shard * tr
    mask_any = (padded_total != total) or (grid_rows > pad_rows)

    # Input tile index; clamp so shard-overshoot tiles stay in bounds
    # (their contribution is fully masked in-kernel).
    if num_shards * tiles_per_shard > num_tiles:
        def in_index(p, t):
            return (jnp.minimum(p * tiles_per_shard + t, num_tiles - 1), 0)
    else:
        def in_index(p, t):
            return (p * tiles_per_shard + t, 0)

    kernel = functools.partial(
        _focal_kernel, gamma=gamma, alpha0=alpha0, alpha1=alpha1,
        full_rows=full_rows, rem_lanes=rem_lanes, mask_any=mask_any,
        tiles_per_shard=tiles_per_shard, tile_rows=tr)

    # Raise the scoped-VMEM limit only when the double-buffered input tiles
    # actually need it (v7x 8192-row default).
    in_bytes = 2 * tr * LANE * (jnp.dtype(y_true.dtype).itemsize +
                                jnp.dtype(y_pred.dtype).itemsize)
    vmem_limit = (48 << 20) if in_bytes > (12 << 20) else None

    partials = pl.pallas_call(
        kernel,
        out_shape=jax.ShapeDtypeStruct((num_shards * SUBLANE, LANE), jnp.float32),
        grid_spec=pltpu.PrefetchScalarGridSpec(
            num_scalar_prefetch=0,
            grid=(num_shards, tiles_per_shard),
            in_specs=[
                pl.BlockSpec((tr, LANE), in_index),
                pl.BlockSpec((tr, LANE), in_index),
            ],
            out_specs=pl.BlockSpec((SUBLANE, LANE), lambda p, t: (p, 0)),
            scratch_shapes=[pltpu.VMEM((SUBLANE, LANE), jnp.float32)],
        ),
        compiler_params=pltpu.CompilerParams(
            dimension_semantics=("parallel", "arbitrary"),
            vmem_limit_bytes=vmem_limit,
        ),
    )(yt2, yp2)

    # Tiny wrapper-side finish over (num_shards*8, 128) partial sums.
    total_sum = jnp.sum(partials)
    if size_average:
        return total_sum / jnp.float32(total)
    return total_sum


def focal_loss_ref(y_true, y_pred, *, gamma, alpha, size_average=True):
    pos = -y_true * (1.0 - y_pred) ** gamma * jnp.log(y_pred + 1e-6)
    neg = -(1.0 - y_true) * (y_pred ** gamma) * jnp.log(1.0 - y_pred + 1e-6)
    loss = alpha[0] * pos + alpha[1] * neg
    return jnp.mean(loss) if size_average else jnp.sum(loss)


if __name__ == "__main__":
    key = jax.random.PRNGKey(0)
    k1, k2, k3, k4, k5, k6 = jax.random.split(key, 6)
    alpha = (0.25, 0.75)

    # 1) Main case: NCHW (2, 4, 16, 16), gamma=2 (integer pow path), plus sum.
    shape = (2, 4, 16, 16)
    y_pred = jax.nn.sigmoid(jax.random.normal(k1, shape, dtype=jnp.float32))
    y_true = (jax.random.uniform(k2, shape) > 0.5).astype(jnp.float32)
    loss = focal_loss(y_true, y_pred, gamma=2, alpha=alpha)
    jax.block_until_ready(loss)
    ref = focal_loss_ref(y_true, y_pred, gamma=2, alpha=alpha)
    assert jnp.allclose(loss, ref, rtol=1e-5, atol=1e-6), (loss, ref)
    loss_s = focal_loss(y_true, y_pred, gamma=2, alpha=alpha, size_average=False)
    ref_s = focal_loss_ref(y_true, y_pred, gamma=2, alpha=alpha, size_average=False)
    assert jnp.allclose(loss_s, ref_s, rtol=1e-5, atol=1e-5), (loss_s, ref_s)

    # 2) Module default gamma=0 with a ragged size (lane pad + mask path).
    shape2 = (3, 5, 7)
    y_pred2 = jax.nn.sigmoid(jax.random.normal(k3, shape2, dtype=jnp.float32))
    y_true2 = (jax.random.uniform(k4, shape2) > 0.5).astype(jnp.float32)
    loss2 = focal_loss(y_true2, y_pred2, gamma=0, alpha=alpha)
    jax.block_until_ready(loss2)
    ref2 = focal_loss_ref(y_true2, y_pred2, gamma=0, alpha=alpha)
    assert jnp.allclose(loss2, ref2, rtol=1e-5, atol=1e-6), (loss2, ref2)

    # 3) Multi-tile + 2 shards + partial boundary block + overshoot tile
    #    (small tile_rows forces the paths a large input would hit).
    shape3 = (2, 4, 16, 20)
    y_pred3 = jax.nn.sigmoid(jax.random.normal(k5, shape3, dtype=jnp.float32))
    y_true3 = (jax.random.uniform(k6, shape3) > 0.5).astype(jnp.float32)
    loss3 = focal_loss(y_true3, y_pred3, gamma=2, alpha=alpha,
                       tile_rows=8, num_shards=2)
    jax.block_until_ready(loss3)
    ref3 = focal_loss_ref(y_true3, y_pred3, gamma=2, alpha=alpha)
    assert jnp.allclose(loss3, ref3, rtol=1e-5, atol=1e-6), (loss3, ref3)

    # 4) Non-integer gamma (float pow fallback path).
    loss4 = focal_loss(y_true, y_pred, gamma=1.5, alpha=alpha)
    jax.block_until_ready(loss4)
    ref4 = focal_loss_ref(y_true, y_pred, gamma=1.5, alpha=alpha)
    assert jnp.allclose(loss4, ref4, rtol=1e-4, atol=1e-5), (loss4, ref4)

    print("KERNEL_OK")
</pallas_src>

<mosaic_0001>
module attributes {stable_mosaic.version = 11 : i64} {
  func.func @_focal_kernel(%arg0: i32, %arg1: i32, %arg2: memref<16x128xf32, #tpu.memory_space<vmem>>, %arg3: memref<16x128xf32, #tpu.memory_space<vmem>>, %arg4: memref<8x128xf32, #tpu.memory_space<vmem>>, %arg5: memref<8x128xf32, #tpu.memory_space<vmem>>) attributes {dimension_semantics = [#tpu.dimension_semantics<parallel>, #tpu.dimension_semantics<arbitrary>], iteration_bounds = array<i64: 1, 1>, scalar_prefetch = 0 : i64, scratch_operands = 1 : i64, tpu.core_type = #tpu.core_type<tc>, window_params = [{transform_indices = @transform_0, window_bounds = array<i64: 16, 128>}, {transform_indices = @transform_1, window_bounds = array<i64: 16, 128>}, {transform_indices = @transform_2, window_bounds = array<i64: 8, 128>}]} {
    %c0_i32 = arith.constant 0 : i32
    %0 = arith.cmpi eq, %arg1, %c0_i32 : i32
    %1 = arith.extui %0 : i1 to i32
    %c0_i32_0 = arith.constant 0 : i32
    %2 = arith.cmpi ne, %1, %c0_i32_0 : i32
    scf.if %2 {
      %cst_18 = arith.constant 0.000000e+00 : f32
      %41 = vector.broadcast %cst_18 : f32 to vector<8x128xf32>
      %c0_19 = arith.constant 0 : index
      %c0_20 = arith.constant 0 : index
      %42 = vector.load %arg5[%c0_19, %c0_20] : memref<8x128xf32, #tpu.memory_space<vmem>>, vector<8x128xf32>
      tpu.vector_store %arg5[%c0_19, %c0_20], %41 {strides = array<i32>} : memref<8x128xf32, #tpu.memory_space<vmem>>, vector<8x128xf32>,
    } else {
    }
    %c0 = arith.constant 0 : index
    %c0_1 = arith.constant 0 : index
    %3 = vector.load %arg3[%c0, %c0_1] : memref<16x128xf32, #tpu.memory_space<vmem>>, vector<16x128xf32>
    %c0_2 = arith.constant 0 : index
    %c0_3 = arith.constant 0 : index
    %4 = vector.load %arg2[%c0_2, %c0_3] : memref<16x128xf32, #tpu.memory_space<vmem>>, vector<16x128xf32>
    %cst = arith.constant 9.99999997E-7 : f32
    %5 = vector.broadcast %cst : f32 to vector<16x128xf32>
    %6 = arith.addf %3, %5 : vector<16x128xf32>
    %7 = math.log %6 : vector<16x128xf32>
    %cst_4 = arith.constant 1.000000e+00 : f32
    %8 = vector.broadcast %cst_4 : f32 to vector<16x128xf32>
    %9 = arith.subf %8, %3 : vector<16x128xf32>
    %cst_5 = arith.constant 9.99999997E-7 : f32
    %10 = vector.broadcast %cst_5 : f32 to vector<16x128xf32>
    %11 = arith.addf %9, %10 : vector<16x128xf32>
    %12 = math.log %11 : vector<16x128xf32>
    %cst_6 = arith.constant 0.000000e+00 : f32
    %13 = vector.broadcast %cst_6 : f32 to vector<16x128xf32>
    %14 = arith.subf %13, %4 : vector<16x128xf32>
    %cst_7 = arith.constant 1.000000e+00 : f32
    %15 = vector.broadcast %cst_7 : f32 to vector<16x128xf32>
    %16 = arith.subf %15, %3 : vector<16x128xf32>
    %17 = arith.mulf %16, %16 : vector<16x128xf32>
    %18 = arith.mulf %14, %17 : vector<16x128xf32>
    %19 = arith.mulf %18, %7 : vector<16x128xf32>
    %cst_8 = arith.constant 1.000000e+00 : f32
    %20 = vector.broadcast %cst_8 : f32 to vector<16x128xf32>
    %21 = arith.subf %20, %4 : vector<16x128xf32>
    %cst_9 = arith.constant 0.000000e+00 : f32
    %22 = vector.broadcast %cst_9 : f32 to vector<16x128xf32>
    %23 = arith.subf %22, %21 : vector<16x128xf32>
    %24 = arith.mulf %3, %3 : vector<16x128xf32>
    %25 = arith.mulf %23, %24 : vector<16x128xf32>
    %26 = arith.mulf %25, %12 : vector<16x128xf32>
    %cst_10 = arith.constant 2.500000e-01 : f32
    %27 = vector.broadcast %cst_10 : f32 to vector<16x128xf32>
    %28 = arith.mulf %27, %19 : vector<16x128xf32>
    %cst_11 = arith.constant 7.500000e-01 : f32
    %29 = vector.broadcast %cst_11 : f32 to vector<16x128xf32>
    %30 = arith.mulf %29, %26 : vector<16x128xf32>
    %31 = arith.addf %28, %30 : vector<16x128xf32>
    %c0_12 = arith.constant 0 : index
    %c0_13 = arith.constant 0 : index
    %32 = vector.load %arg5[%c0_12, %c0_13] : memref<8x128xf32, #tpu.memory_space<vmem>>, vector<8x128xf32>
    %33 = vector.extract_strided_slice %31 {offsets = [0, 0], sizes = [8, 128], strides = [1, 1]} : vector<16x128xf32> to vector<8x128xf32>
    %34 = vector.extract_strided_slice %31 {offsets = [8, 0], sizes = [8, 128], strides = [1, 1]} : vector<16x128xf32> to vector<8x128xf32>
    %35 = arith.addf %33, %34 : vector<8x128xf32>
    %36 = arith.addf %32, %35 : vector<8x128xf32>
    %c0_14 = arith.constant 0 : index
    %c0_15 = arith.constant 0 : index
    %37 = vector.load %arg5[%c0_14, %c0_15] : memref<8x128xf32, #tpu.memory_space<vmem>>, vector<8x128xf32>
    tpu.vector_store %arg5[%c0_14, %c0_15], %36 {strides = array<i32>} : memref<8x128xf32, #tpu.memory_space<vmem>>, vector<8x128xf32>,
    %c0_i32_16 = arith.constant 0 : i32
    %38 = arith.cmpi eq, %arg1, %c0_i32_16 : i32
    %39 = arith.extui %38 : i1 to i32
    %c0_i32_17 = arith.constant 0 : i32
    %40 = arith.cmpi ne, %39, %c0_i32_17 : i32
    scf.if %40 {
      %c0_18 = arith.constant 0 : index
      %c0_19 = arith.constant 0 : index
      %41 = vector.load %arg5[%c0_18, %c0_19] : memref<8x128xf32, #tpu.memory_space<vmem>>, vector<8x128xf32>
      %c0_20 = arith.constant 0 : index
      %c0_21 = arith.constant 0 : index
      %42 = vector.load %arg4[%c0_20, %c0_21] : memref<8x128xf32, #tpu.memory_space<vmem>>, vector<8x128xf32>
      tpu.vector_store %arg4[%c0_20, %c0_21], %41 {strides = array<i32>} : memref<8x128xf32, #tpu.memory_space<vmem>>, vector<8x128xf32>,
    } else {
    }
    return
  }
  func.func @transform_0(%arg0: i32, %arg1: i32) -> (i32, i32) {
    %c1_i32 = arith.constant 1 : i32
    %0 = arith.muli %arg0, %c1_i32 : i32
    %1 = arith.addi %0, %arg1 : i32
    %c0_i32 = arith.constant 0 : i32
    %c0_i32_0 = arith.constant 0 : i32
    return %1, %c0_i32 : i32, i32
  }
  func.func @transform_1(%arg0: i32, %arg1: i32) -> (i32, i32) {
    %c1_i32 = arith.constant 1 : i32
    %0 = arith.muli %arg0, %c1_i32 : i32
    %1 = arith.addi %0, %arg1 : i32
    %c0_i32 = arith.constant 0 : i32
    %c0_i32_0 = arith.constant 0 : i32
    return %1, %c0_i32 : i32, i32
  }
  func.func @transform_2(%arg0: i32, %arg1: i32) -> (i32, i32) {
    %c0_i32 = arith.constant 0 : i32
    %c0_i32_0 = arith.constant 0 : i32
    return %arg0, %c0_i32 : i32, i32
  }
}

</mosaic_0001>

<bundles_post_ra>
// kernel: tpu_custom_call.1
= control target key start
LH: loop header
LB: loop body
LE: loop exit
PB: predicated region body
PF: predicated region fallthrough
CT: control target
= control target key end

     0   :  { %7 = vsyncpa [#allocation4], 0  ;;  %s250_s0 = inlined_call_operand.hbm [shape: f32[16,128], index: 0, kind: input, shape index: {}]   ;;  %s251_s1 = inlined_call_operand.hbm [shape: f32[16,128], index: 1, kind: input, shape index: {}]   ;;  %s252_s2 = inlined_call_operand.hbm [shape: f32[8,128], index: 2, kind: output, shape index: {}]  }
   0x1   :  { %8 = vsyncpa [#allocation7], 0 }
   0x2   :  { %9 = vsyncpa [#allocation5], 0  ;;  %s18_s11 = sshll.u32 %s250_s0, 4  ;;  %s221_s12 = smov [#allocation3]   ;;  %s19_s11 = int_to_ptr.hbm [resolvable:$true] %s18_s11 }
   0x3   :  { %s20_s13 = sshll.u32 %s221_s12, 4  ;;  %s35_s16 = sshll.u32 %s251_s1, 4  ;;  %s21_s13 = int_to_ptr.vmem [resolvable:$true] %s20_s13  ;;  %s36_s16 = int_to_ptr.hbm [resolvable:$true] %s35_s16 }
   0x4   :  { %s222_s17 = smov 128   ;;  %s223_s18 = smov 8  }
   0x5   :  { %26 = dma.hbm_to_vmem [thread:$0]  %s19_s11, 256, %s21_s13, [#allocation4], %s222_s17, %s222_s17, %s223_s18  }
   0x6   :  { %s224_s19 = smov [#allocation6]  }
   0x7   :  { %s37_s20 = sshll.u32 %s224_s19, 4  ;;  %s38_s20 = int_to_ptr.vmem [resolvable:$true] %s37_s20 }
   0x8   :  { %43 = dma.hbm_to_vmem [thread:$0]  %s36_s16, 256, %s38_s20, [#allocation7], %s222_s17, %s222_s17, %s223_s18  }
   0x9   :  { %215 = dma.done.wait [#allocation4], 256  }
   0xa   :  { %216 = vsyncadd [#allocation4], 4294967040 }
   0xb   :  { %217 = dma.done.wait [#allocation7], 256  }
   0xc   :  { %218 = vsyncadd [#allocation7], 4294967040  ;;  %v61_v0 = vld [vmem:[#allocation6] sm:$0xff]  ;;  %v62_v1 = vld [vmem:[#allocation6 + $0x8] sm:$0xff]  ;;  %s225_s0 = smov [#allocation8]   ;;  %s119_s23 = sshll.u32 %s252_s2, 4  ;;  %s120_s23 = int_to_ptr.hbm [resolvable:$true] %s119_s23 }
   0xd   :  { %v63_v2 = vld [vmem:[#allocation3] sm:$0xff]  ;;  %v64_v3 = vld [vmem:[#allocation3 + $0x8] sm:$0xff]  ;;  %v65_v4 = vadd.f32 1e-06, %v61_v0  ;;  %v66_v5 = vadd.f32 1e-06, %v62_v1  ;;  %v91_v17 = vmul.f32 %v61_v0, %v61_v0  ;;  %v92_v19 = vmul.f32 %v62_v1, %v62_v1 }
   0xe   :  { %v71_v6 = vsub.f32 1.0, %v61_v0  ;;  %v72_v7 = vsub.f32 1.0, %v62_v1  ;;  %v87_v8 = vsub.f32 1.0, %v63_v2  ;;  %v88_v10 = vsub.f32 1.0, %v64_v3  ;;  %s117_s1 = sshll.u32 %s225_s0, 4  ;;  %s118_s1 = int_to_ptr.vmem [resolvable:$true] %s117_s1 }
   0xf   :  { %135 = vlog2.f32 %v65_v4  ;;  %v79_v12 = vsub.f32 0.0, %v63_v2  ;;  %v80_v14 = vsub.f32 0.0, %v64_v3 }
  0x10   :  { %v73_v9 = vadd.f32 1e-06, %v71_v6  ;;  %137 = vlog2.f32 %v66_v5  ;;  %v74_v11 = vadd.f32 1e-06, %v72_v7  ;;  %v81_v13 = vmul.f32 %v71_v6, %v71_v6 }
  0x11   :  { %v82_v15 = vmul.f32 %v72_v7, %v72_v7  ;;  %v89_v16 = vsub.f32 0.0, %v87_v8  ;;  %v90_v18 = vsub.f32 0.0, %v88_v10 }
  0x12   :  { %139 = vlog2.f32 %v73_v9  ;;  %v83_v20 = vmul.f32 %v81_v13, %v79_v12 }
  0x13   :  { %141 = vlog2.f32 %v74_v11  ;;  %v84_v22 = vmul.f32 %v82_v15, %v80_v14  ;;  %v93_v25 = vmul.f32 %v91_v17, %v89_v16  ;;  %v94_v28 = vmul.f32 %v92_v19, %v90_v18 }
  0x15   :  { %v136_v21 = vpop.eup %135 }
  0x16   :  { %v138_v23 = vpop.eup %137  ;;  %v68_v24 = vmul.f32 0.6931472, %v136_v21 }
  0x17   :  { %v70_v27 = vmul.f32 0.6931472, %v138_v23 }
  0x18   :  { %v140_v26 = vpop.eup %139  ;;  %v85_v31 = vmul.f32 %v83_v20, %v68_v24 }
  0x19   :  { %v142_v29 = vpop.eup %141  ;;  %v76_v30 = vmul.f32 0.6931472, %v140_v26  ;;  %v86_v33 = vmul.f32 %v84_v22, %v70_v27 }
  0x1a   :  { %v78_v32 = vmul.f32 0.6931472, %v142_v29  ;;  %v97_v35 = vmul.f32 0.25, %v85_v31 }
  0x1b   :  { %v95_v34 = vmul.f32 %v93_v25, %v76_v30  ;;  %v98_v37 = vmul.f32 0.25, %v86_v33 }
  0x1c   :  { %v96_v36 = vmul.f32 %v94_v28, %v78_v32 }
  0x1d   :  { %v99_v38 = vmul.f32 0.75, %v95_v34 }
  0x1e   :  { %v100_v39 = vmul.f32 0.75, %v96_v36 }
  0x1f   :  { %v101_v40 = vadd.f32 %v99_v38, %v97_v35 }
  0x20   :  { %v102_v41 = vadd.f32 %v100_v39, %v98_v37 }
  0x22   :  { %v104_v42 = vadd.f32 %v102_v41, %v101_v40 }
  0x24   :  { %111 = vst [vmem:[#allocation8] sm:$0xff] %v104_v42 }
  0x25   :  { %122 = dma.vmem_to_hbm [thread:$0]  %s118_s1, 128, %s120_s23, [#allocation5]  }
  0x26   :  { %219 = dma.done.wait [#allocation5], 128  }
  0x27   :  { %220 = vsyncadd [#allocation5], 4294967168 }
  0x28   :  { %127 = vsyncpa [#allocation4], 1 }
  0x29   :  { %128 = vsyncpa [#allocation7], 1 }
  0x2a   :  { %129 = vsyncpa [#allocation5], 1 }

</bundles_post_ra>
